<compile_context>
chip_gen: v5e
topology: v5e:2x2
jax: 0.10.0
libtpu: 0.0.40
codegen_flags: <defaults>
</compile_context>

<pallas_src>
import functools

import jax
import jax.numpy as jnp
from jax.experimental import pallas as pl
from jax.experimental.pallas import tpu as pltpu

_MIB = 1024 * 1024


def _round_up(x, m):
    return (x + m - 1) // m * m


def _vmem_limit(est_bytes):
    # 2x headroom over the estimated tile footprint, never below the 32 MiB
    # default, never above 48 MiB (v7x physical VMEM is 64 MiB per core).
    return int(min(48 * _MIB, max(32 * _MIB, 2 * est_bytes)))


def _pick_tm(M, C, x_itemsize):
    """Row tile for the H==W==1 path: ~2 MiB of x per grid step, >=4 grid
    steps when M allows (v7x megacore + pipelining), multiple of 16 rows."""
    tm = max(256, (2 * _MIB) // max(1, C * x_itemsize))
    tm = min(tm, 4096)
    if M >= 64:
        tm = min(tm, _round_up(pl.cdiv(M, 4), 16))   # >= 4 pipelined steps
    tm = min(tm, _round_up(M, 16))
    return max(16, (tm // 16) * 16)


# ----------------------------- Pallas kernels ------------------------------

def _rows_kernel(x_ref, w_ref, bc_ref, bb_ref, cls_ref, box_ref, *, cls_num):
    # x: (tm, C); w: (C, cls_num + box_out); biases f32 (1, cls_num)/(1, box_out)
    acc = jnp.dot(x_ref[...], w_ref[...], preferred_element_type=jnp.float32)
    cls = acc[:, :cls_num] + bc_ref[...]
    box = acc[:, cls_num:] + bb_ref[...]
    # fused row softmax (H==W==1 -> flattened dim is exactly cls_num)
    m = jnp.max(cls, axis=-1, keepdims=True)
    e = jnp.exp(cls - m)
    cls_ref[...] = (e / jnp.sum(e, axis=-1, keepdims=True)).astype(cls_ref.dtype)
    box_ref[...] = box.astype(box_ref.dtype)


def _image_kernel(x_ref, wc_ref, wb_ref, bc_ref, bb_ref, cls_ref, box_ref):
    # x: (C, HW); weights (cls,C)/(box,C); biases f32 (cls,1)/(box,1)
    x = x_ref[...]
    cls = jnp.dot(wc_ref[...], x, preferred_element_type=jnp.float32) + bc_ref[...]
    box = jnp.dot(wb_ref[...], x, preferred_element_type=jnp.float32) + bb_ref[...]
    # fused per-image softmax over ALL cls_num*H*W elements (torch dim=1)
    m = jnp.max(cls)
    e = jnp.exp(cls - m)
    cls_ref[...] = (e / jnp.sum(e)).astype(cls_ref.dtype)
    box_ref[...] = box.astype(box_ref.dtype)


# ------------------------------ JAX wrappers --------------------------------

def _forward_rows(x2d, w_t, bc_row, bb_row, cls_num, box_out):
    M, C = x2d.shape
    Co = cls_num + box_out
    tm = _pick_tm(M, C, x2d.dtype.itemsize)
    grid_m = pl.cdiv(M, tm)

    xi, wi = x2d.dtype.itemsize, w_t.dtype.itemsize
    est = (2 * tm * C * xi            # streamed x tiles (double buffered)
           + 2 * tm * Co * 4          # streamed output tiles
           + 2 * C * Co * wi + Co * 4)  # resident fused weight + biases
    cost = pl.CostEstimate(
        flops=2 * M * C * Co,
        transcendentals=M * cls_num,
        bytes_accessed=M * C * xi + C * Co * wi + M * Co * 4)

    kernel = functools.partial(_rows_kernel, cls_num=cls_num)
    return pl.pallas_call(
        kernel,
        out_shape=(jax.ShapeDtypeStruct((M, cls_num), jnp.float32),
                   jax.ShapeDtypeStruct((M, box_out), jnp.float32)),
        grid=(grid_m,),
        in_specs=[
            pl.BlockSpec((tm, C), lambda i: (i, 0)),        # streamed rows of x
            pl.BlockSpec((C, Co), lambda i: (0, 0)),        # resident fused weight
            pl.BlockSpec((1, cls_num), lambda i: (0, 0)),   # resident cls bias
            pl.BlockSpec((1, box_out), lambda i: (0, 0)),   # resident bbox bias
        ],
        out_specs=(
            pl.BlockSpec((tm, cls_num), lambda i: (i, 0)),  # exact-shaped outputs
            pl.BlockSpec((tm, box_out), lambda i: (i, 0)),
        ),
        compiler_params=pltpu.CompilerParams(
            dimension_semantics=("parallel",),              # megacore on v7x
            vmem_limit_bytes=_vmem_limit(est)),
        cost_estimate=cost,
    )(x2d, w_t, bc_row, bb_row)


def _forward_images(x3d, wc, wb, bc_col, bb_col):
    N, C, HW = x3d.shape
    cls_num, box_out = wc.shape[0], wb.shape[0]
    Co = cls_num + box_out

    xi, wi = x3d.dtype.itemsize, wc.dtype.itemsize
    est = (2 * C * HW * xi + 2 * Co * HW * 4 + 2 * Co * C * wi + Co * 4)
    cost = pl.CostEstimate(
        flops=2 * N * HW * C * Co,
        transcendentals=N * cls_num * HW,
        bytes_accessed=N * C * HW * xi + Co * C * wi + N * Co * HW * 4)

    return pl.pallas_call(
        _image_kernel,
        out_shape=(jax.ShapeDtypeStruct((N, cls_num, HW), jnp.float32),
                   jax.ShapeDtypeStruct((N, box_out, HW), jnp.float32)),
        grid=(N,),
        in_specs=[
            pl.BlockSpec((None, C, HW), lambda n: (n, 0, 0)),  # x[n] -> (C, HW)
            pl.BlockSpec((cls_num, C), lambda n: (0, 0)),      # resident weights
            pl.BlockSpec((box_out, C), lambda n: (0, 0)),
            pl.BlockSpec((cls_num, 1), lambda n: (0, 0)),      # resident biases
            pl.BlockSpec((box_out, 1), lambda n: (0, 0)),
        ],
        out_specs=(
            pl.BlockSpec((None, cls_num, HW), lambda n: (n, 0, 0)),
            pl.BlockSpec((None, box_out, HW), lambda n: (n, 0, 0)),
        ),
        compiler_params=pltpu.CompilerParams(
            dimension_semantics=("parallel",),
            vmem_limit_bytes=_vmem_limit(est)),
        cost_estimate=cost,
    )(x3d, wc, wb, bc_col, bb_col)


def _prep_params(cls_w, cls_b, bbox_w, bbox_b, compute_dtype):
    """One-time weight prep (done in __init__, not per forward call)."""
    cls_num, C = cls_w.shape
    box_out = bbox_w.shape[0]
    return dict(
        dim_in=C, cls_num=cls_num, box_out=box_out,
        # H==W==1 path: fused, transposed weight (C, Co) in compute dtype
        w_t=jnp.concatenate([cls_w, bbox_w], axis=0).T.astype(compute_dtype),
        bc_row=cls_b.reshape(1, cls_num).astype(jnp.float32),
        bb_row=bbox_b.reshape(1, box_out).astype(jnp.float32),
        # H*W>1 path: per-head weights (rows on sublanes, C on lanes)
        wc=cls_w.astype(compute_dtype),
        wb=bbox_w.astype(compute_dtype),
        bc_col=cls_b.reshape(cls_num, 1).astype(jnp.float32),
        bb_col=bbox_b.reshape(box_out, 1).astype(jnp.float32),
    )


def _apply(x_nchw, p):
    N, C, H, W = x_nchw.shape
    assert C == p["dim_in"]
    if H * W == 1:
        # pure reshape (no copy), exact-shaped outputs, softmax fused in kernel
        return _forward_rows(x_nchw.reshape(N, C), p["w_t"],
                             p["bc_row"], p["bb_row"],
                             p["cls_num"], p["box_out"])
    # collapse trailing H,W (pure reshape); results land in CHW .view order
    cls3d, box3d = _forward_images(x_nchw.reshape(N, C, H * W),
                                   p["wc"], p["wb"], p["bc_col"], p["bb_col"])
    return cls3d.reshape(N, -1), box3d.reshape(N, -1)


def bbox_head_forward(x_nchw, cls_w, cls_b, bbox_w, bbox_b, *,
                      compute_dtype=jnp.bfloat16):
    """Eval-mode BboxHead forward from raw (torch-layout) parameters."""
    return _apply(x_nchw, _prep_params(cls_w, cls_b, bbox_w, bbox_b, compute_dtype))


class BboxHeadPallas:
    """Eval-mode BboxHead with deterministically initialized parameters.
    Fused/cast weights are precomputed once per compute dtype."""

    def __init__(self, dim_in, cls_num, cls_agnostic_bbox_regression=False,
                 key=None, compute_dtype=jnp.bfloat16):
        if key is None:
            key = jax.random.PRNGKey(0)
        self.cls_num = cls_num
        self.cls_agnostic_bbox_regression = cls_agnostic_bbox_regression
        self.compute_dtype = compute_dtype
        box_out = 4 * (1 if cls_agnostic_bbox_regression else cls_num)

        k1, k2 = jax.random.split(key)
        # nn.init.normal_(std=0.01) / (std=0.001); biases zero.
        self.cls_w = 0.01 * jax.random.normal(k1, (cls_num, dim_in), jnp.float32)
        self.cls_b = jnp.zeros((cls_num,), jnp.float32)
        self.bbox_w = 0.001 * jax.random.normal(k2, (box_out, dim_in), jnp.float32)
        self.bbox_b = jnp.zeros((box_out,), jnp.float32)

        self._params_cache = {}
        self._params(compute_dtype)     # precompute fused weights once

    def _params(self, dt):
        name = jnp.dtype(dt).name
        if name not in self._params_cache:
            self._params_cache[name] = _prep_params(
                self.cls_w, self.cls_b, self.bbox_w, self.bbox_b, dt)
        return self._params_cache[name]

    def __call__(self, x, compute_dtype=None):
        dt = self.compute_dtype if compute_dtype is None else compute_dtype
        return _apply(x, self._params(dt))


# ---------------------------------- main ------------------------------------

if __name__ == "__main__":
    key = jax.random.PRNGKey(0)
    kx, kx1, kp = jax.random.split(key, 3)

    N, dim_in, H, W = 2, 32, 16, 16
    cls_num = 8
    box_out = 4 * cls_num

    x = jax.random.normal(kx, (N, dim_in, H, W), jnp.float32)
    head = BboxHeadPallas(dim_in, cls_num, key=kp)   # default: bf16 weights

    def ref_forward(x, cls_w, cls_b, bbox_w, bbox_b):
        n = x.shape[0]
        cls = jnp.einsum("nchw,oc->nohw", x, cls_w) + cls_b[None, :, None, None]
        box = jnp.einsum("nchw,oc->nohw", x, bbox_w) + bbox_b[None, :, None, None]
        return jax.nn.softmax(cls.reshape(n, -1), axis=1), box.reshape(n, -1)

    ref_cls, ref_box = ref_forward(x, head.cls_w, head.cls_b,
                                   head.bbox_w, head.bbox_b)

    # ---- H,W > 1 path: exact f32 compute ----
    cls_f32, box_f32 = head(x, compute_dtype=jnp.float32)
    jax.block_until_ready((cls_f32, box_f32))
    assert cls_f32.shape == (N, cls_num * H * W)
    assert box_f32.shape == (N, box_out * H * W)
    assert jnp.allclose(cls_f32, ref_cls, atol=1e-5, rtol=1e-4)
    assert jnp.allclose(box_f32, ref_box, atol=1e-5, rtol=1e-3)

    # ---- H,W > 1 path: default bf16 weights (halved weight traffic) ----
    cls_bf, box_bf = head(x)
    jax.block_until_ready((cls_bf, box_bf))
    assert jnp.allclose(cls_bf, ref_cls, atol=1e-4, rtol=5e-2)
    assert jnp.allclose(box_bf, ref_box, atol=2e-3, rtol=5e-2)

    # ---- H == W == 1 path (typical RoI-head shape, fused softmax epilogue) ----
    M = 64
    x1 = jax.random.normal(kx1, (M, dim_in, 1, 1), jnp.float32)
    ref_cls1, ref_box1 = ref_forward(x1, head.cls_w, head.cls_b,
                                     head.bbox_w, head.bbox_b)
    cls1, box1 = head(x1, compute_dtype=jnp.float32)
    jax.block_until_ready((cls1, box1))
    assert cls1.shape == (M, cls_num) and box1.shape == (M, box_out)
    assert jnp.allclose(cls1, ref_cls1, atol=1e-5, rtol=1e-4)
    assert jnp.allclose(box1, ref_box1, atol=1e-5, rtol=1e-3)

    cls1b, box1b = head(x1)     # default bf16 path
    jax.block_until_ready((cls1b, box1b))
    assert jnp.allclose(cls1b, ref_cls1, atol=1e-3, rtol=5e-2)
    assert jnp.allclose(box1b, ref_box1, atol=2e-3, rtol=5e-2)

    print("KERNEL_OK")
</pallas_src>

<mosaic_0001>
module attributes {stable_mosaic.version = 11 : i64} {
  func.func @_image_kernel(%arg0: i32, %arg1: memref<1x32x256xf32, #tpu.memory_space<vmem>>, %arg2: memref<8x32xf32, #tpu.memory_space<vmem>>, %arg3: memref<32x32xf32, #tpu.memory_space<vmem>>, %arg4: memref<8x1xf32, #tpu.memory_space<vmem>>, %arg5: memref<32x1xf32, #tpu.memory_space<vmem>>, %arg6: memref<1x8x256xf32, #tpu.memory_space<vmem>>, %arg7: memref<1x32x256xf32, #tpu.memory_space<vmem>>) attributes {dimension_semantics = [#tpu.dimension_semantics<parallel>], iteration_bounds = array<i64: 2>, scalar_prefetch = 0 : i64, scratch_operands = 0 : i64, tpu.core_type = #tpu.core_type<tc>, window_params = [{transform_indices = @transform_0, window_bounds = array<i64: 1, 32, 256>}, {pipeline_mode = #tpu.pipeline_mode<synchronous>, transform_indices = @transform_1, window_bounds = array<i64: 8, 32>}, {pipeline_mode = #tpu.pipeline_mode<synchronous>, transform_indices = @transform_2, window_bounds = array<i64: 32, 32>}, {pipeline_mode = #tpu.pipeline_mode<synchronous>, transform_indices = @transform_3, window_bounds = array<i64: 8, 1>}, {pipeline_mode = #tpu.pipeline_mode<synchronous>, transform_indices = @transform_4, window_bounds = array<i64: 32, 1>}, {transform_indices = @transform_5, window_bounds = array<i64: 1, 8, 256>}, {transform_indices = @transform_6, window_bounds = array<i64: 1, 32, 256>}]} {
    %c0 = arith.constant 0 : index
    %c0_0 = arith.constant 0 : index
    %c0_1 = arith.constant 0 : index
    %0 = vector.load %arg1[%c0, %c0_0, %c0_1] : memref<1x32x256xf32, #tpu.memory_space<vmem>>, vector<1x32x256xf32>
    %1 = vector.shape_cast %0 : vector<1x32x256xf32> to vector<32x256xf32>
    %c0_2 = arith.constant 0 : index
    %c0_3 = arith.constant 0 : index
    %2 = vector.load %arg2[%c0_2, %c0_3] : memref<8x32xf32, #tpu.memory_space<vmem>>, vector<8x32xf32>
    %cst = arith.constant dense<0.000000e+00> : vector<8x256xf32>
    %3 = tpu.matmul %2, %1, %cst {dimension_numbers = #tpu.dot_dimension_numbers<[1], [0], [0], [1], [0, 0, 1, 1], [], []>} : vector<8x32xf32>, vector<32x256xf32>, vector<8x256xf32> -> vector<8x256xf32>
    %c0_4 = arith.constant 0 : index
    %c0_5 = arith.constant 0 : index
    %4 = vector.load %arg4[%c0_4, %c0_5] : memref<8x1xf32, #tpu.memory_space<vmem>>, vector<8x1xf32>
    %5 = vector.broadcast %4 : vector<8x1xf32> to vector<8x256xf32>
    %6 = arith.addf %3, %5 : vector<8x256xf32>
    %c0_6 = arith.constant 0 : index
    %c0_7 = arith.constant 0 : index
    %7 = vector.load %arg3[%c0_6, %c0_7] : memref<32x32xf32, #tpu.memory_space<vmem>>, vector<32x32xf32>
    %cst_8 = arith.constant dense<0.000000e+00> : vector<32x256xf32>
    %8 = tpu.matmul %7, %1, %cst_8 {dimension_numbers = #tpu.dot_dimension_numbers<[1], [0], [0], [1], [0, 0, 1, 1], [], []>} : vector<32x32xf32>, vector<32x256xf32>, vector<32x256xf32> -> vector<32x256xf32>
    %c0_9 = arith.constant 0 : index
    %c0_10 = arith.constant 0 : index
    %9 = vector.load %arg5[%c0_9, %c0_10] : memref<32x1xf32, #tpu.memory_space<vmem>>, vector<32x1xf32>
    %10 = vector.broadcast %9 : vector<32x1xf32> to vector<32x256xf32>
    %11 = arith.addf %8, %10 : vector<32x256xf32>
    %12 = vector.shape_cast %6 : vector<8x256xf32> to vector<1x8x256xf32>
    %cst_11 = arith.constant dense<0xFF800000> : vector<1xf32>
    %13 = vector.multi_reduction <maximumf>, %12, %cst_11 [1, 2] : vector<1x8x256xf32> to vector<1xf32>
    %14 = vector.shape_cast %13 : vector<1xf32> to vector<1x1x1xf32>
    %15 = vector.extract %14[0, 0, 0] : f32 from vector<1x1x1xf32>
    %16 = vector.broadcast %15 : f32 to vector<8x256xf32>
    %17 = arith.subf %6, %16 : vector<8x256xf32>
    %18 = math.exp %17 : vector<8x256xf32>
    %19 = vector.shape_cast %18 : vector<8x256xf32> to vector<1x8x256xf32>
    %cst_12 = arith.constant dense<0.000000e+00> : vector<1xf32>
    %20 = vector.multi_reduction <add>, %19, %cst_12 [1, 2] : vector<1x8x256xf32> to vector<1xf32>
    %21 = vector.shape_cast %20 : vector<1xf32> to vector<1x1x1xf32>
    %22 = vector.extract %21[0, 0, 0] : f32 from vector<1x1x1xf32>
    %23 = vector.broadcast %22 : f32 to vector<8x256xf32>
    %24 = arith.divf %18, %23 : vector<8x256xf32>
    %c0_13 = arith.constant 0 : index
    %c0_14 = arith.constant 0 : index
    %c0_15 = arith.constant 0 : index
    %25 = vector.load %arg6[%c0_13, %c0_14, %c0_15] : memref<1x8x256xf32, #tpu.memory_space<vmem>>, vector<1x8x256xf32>
    %26 = vector.shape_cast %25 : vector<1x8x256xf32> to vector<8x256xf32>
    %27 = vector.shape_cast %24 : vector<8x256xf32> to vector<1x8x256xf32>
    tpu.vector_store %arg6[%c0_13, %c0_14, %c0_15], %27 {strides = array<i32>} : memref<1x8x256xf32, #tpu.memory_space<vmem>>, vector<1x8x256xf32>,
    %c0_16 = arith.constant 0 : index
    %c0_17 = arith.constant 0 : index
    %c0_18 = arith.constant 0 : index
    %28 = vector.load %arg7[%c0_16, %c0_17, %c0_18] : memref<1x32x256xf32, #tpu.memory_space<vmem>>, vector<1x32x256xf32>
    %29 = vector.shape_cast %28 : vector<1x32x256xf32> to vector<32x256xf32>
    %30 = vector.shape_cast %11 : vector<32x256xf32> to vector<1x32x256xf32>
    tpu.vector_store %arg7[%c0_16, %c0_17, %c0_18], %30 {strides = array<i32>} : memref<1x32x256xf32, #tpu.memory_space<vmem>>, vector<1x32x256xf32>,
    return
  }
  func.func @transform_0(%arg0: i32) -> (i32, i32, i32) {
    %c0_i32 = arith.constant 0 : i32
    %c0_i32_0 = arith.constant 0 : i32
    %c0_i32_1 = arith.constant 0 : i32
    return %arg0, %c0_i32, %c0_i32_0 : i32, i32, i32
  }
  func.func @transform_1(%arg0: i32) -> (i32, i32) {
    %c0_i32 = arith.constant 0 : i32
    %c0_i32_0 = arith.constant 0 : i32
    %c0_i32_1 = arith.constant 0 : i32
    return %c0_i32, %c0_i32_0 : i32, i32
  }
  func.func @transform_2(%arg0: i32) -> (i32, i32) {
    %c0_i32 = arith.constant 0 : i32
    %c0_i32_0 = arith.constant 0 : i32
    %c0_i32_1 = arith.constant 0 : i32
    return %c0_i32, %c0_i32_0 : i32, i32
  }
  func.func @transform_3(%arg0: i32) -> (i32, i32) {
    %c0_i32 = arith.constant 0 : i32
    %c0_i32_0 = arith.constant 0 : i32
    %c0_i32_1 = arith.constant 0 : i32
    return %c0_i32, %c0_i32_0 : i32, i32
  }
  func.func @transform_4(%arg0: i32) -> (i32, i32) {
    %c0_i32 = arith.constant 0 : i32
    %c0_i32_0 = arith.constant 0 : i32
    %c0_i32_1 = arith.constant 0 : i32
    return %c0_i32, %c0_i32_0 : i32, i32
  }
  func.func @transform_5(%arg0: i32) -> (i32, i32, i32) {
    %c0_i32 = arith.constant 0 : i32
    %c0_i32_0 = arith.constant 0 : i32
    %c0_i32_1 = arith.constant 0 : i32
    return %arg0, %c0_i32, %c0_i32_0 : i32, i32, i32
  }
  func.func @transform_6(%arg0: i32) -> (i32, i32, i32) {
    %c0_i32 = arith.constant 0 : i32
    %c0_i32_0 = arith.constant 0 : i32
    %c0_i32_1 = arith.constant 0 : i32
    return %arg0, %c0_i32, %c0_i32_0 : i32, i32, i32
  }
}

</mosaic_0001>

<bundles_post_ra>
// kernel: tpu_custom_call.1
= control target key start
LH: loop header
LB: loop body
LE: loop exit
PB: predicated region body
PF: predicated region fallthrough
CT: control target
= control target key end

     0   :  { %12 = vsyncpa [#allocation3], 0  ;;  %s1120_s0 = inlined_call_operand.hbm [shape: f32[2,32,256], index: 0, kind: input, shape index: {}]   ;;  %s1121_s1 = inlined_call_operand.vmem [shape: f32[8,32], index: 1, kind: input, shape index: {}]   ;;  %s1122_s2 = inlined_call_operand.vmem [shape: f32[32,32], index: 2, kind: input, shape index: {}]   ;;  %s1123_s3 = inlined_call_operand.vmem [shape: f32[8,1], index: 3, kind: input, shape index: {}]   ;;  %s1124_s4 = inlined_call_operand.vmem [shape: f32[32,1], index: 4, kind: input, shape index: {}]   ;;  %s1125_s5 = inlined_call_operand.hbm [shape: f32[2,8,256], index: 5, kind: output, shape index: {0}]   ;;  %s1126_s6 = inlined_call_operand.hbm [shape: f32[2,32,256], index: 6, kind: output, shape index: {1}]  }
   0x1   :  { %14 = vsyncpa [#allocation3 + $0x1], 0 }
   0x2   :  { %15 = vsyncpa [#allocation4], 0 }
   0x3   :  { %17 = vsyncpa [#allocation4 + $0x1], 0 }
   0x4   :  { %18 = vsyncpa [#allocation7], 0 }
   0x5   :  { %20 = vsyncpa [#allocation7 + $0x1], 0  ;;  %s914_s21 = smov 0   ;;  %s916_s22 = smov 0  }
   0x6   :  { %s918_s23 = smov 0   ;;  %s920_s24 = smov 0  }
   0x7 LB: > { %s935_s25 = sadd.s32 4294967295, %s872_s24   ;;  %s636_s26 = sadd.s32 4294967294, %s872_s24   ;;  %s872_s24 = sphi %s920_s24, %s1136_s24   ;;  %s868_s23 = sphi %s918_s23, %s1135_s23   ;;  %s864_s22 = sphi %s916_s22, %s1134_s22   ;;  %s860_s21 = sphi %s914_s21, %s1133_s21  }
   0x8   : > { %s939_s27 = sadd.s32 1, %s872_s24   ;;  %s33_s28 = sadd.s32 1, %s868_s23 }
   0x9   : > { %s30_s29 = ssub.s32 %s872_s24, %s939_s27  ;;  %p40_p0 = scmp.ne.s32.totalorder %s868_s23, %s864_s22 }
   0xa   : > { %p31_p1 = scmp.eq.s32.totalorder %s30_s29, 0  ;;  %p41_p2 = scmp.eq.s32.totalorder %s872_s24, 0 }
   0xb   : > { %p46_p3 = scmp.ne.s32.totalorder %s864_s22, %s860_s21  ;;  %p47_p4 = scmp.eq.s32.totalorder %s935_s25, 0 }
   0xc   : > { %s951_s30 = scalar_select %p31_p1, %s868_s23, %s33_s28  }
   0xd   : > { %p953_p5 = por %p41_p2, %p40_p0  ;;  %p957_p6 = por %p47_p4, %p46_p3 }
   0xe   : > { %p154_p7 = scmp.eq.s32.totalorder %s935_s25, 1  ;;  %p160_p8 = scmp.eq.s32.totalorder %s636_s26, 1 }
   0xf   : > { %p696_p10 = scmp.lt.s32.totalorder %s872_s24, 2  ;;  %s218_s11 = sand.u32 1, %s868_s23  }
  0x10   : > { %p964_p11 = por %p154_p7, %p40_p0  ;;  %p968_p12 = por %p160_p8, %p46_p3 }
  0x11   : > { %s664_s12 = sshll.u32 %s872_s24, 6  ;;  %s639_s13 = sshll.u32 %s218_s11, 6 }
  0x12   : > { %s227_s16 = scalar_lea.hbm %s1120_s0, %s664_s12  ;;  %s222_s18 = scalar_lea.vmem [#allocation2], %s639_s13 }
  0x13   : > { %s228_s17 = sshll.u32 %s227_s16, 4  ;;  %s230_s19 = sshll.u32 %s222_s18, 4  ;;  %s229_s17 = int_to_ptr.hbm [resolvable:$true] %s228_s17  ;;  %s231_s19 = int_to_ptr.vmem [resolvable:$true] %s230_s19 }
  0x14   : > { %p979_p13 = pnand %p696_p10, %p953_p5  ;;  %p642_p0 = scmp.ge.s32.totalorder %s872_s24, 1 }
  0x15   : > { %p238_p1 = scmp.lt.s32.totalorder %s872_s24, 3  ;;  %s219_s26 = scalar_lea.sflag [#allocation3], %s218_s11 }
  0x16   : > { %s744_s28 = sshra.s32 %s229_s17, 4  ;;  %p748_p3 = pneg %p979_p13  ;;  %s745_s28 = int_to_ptr.hbm [resolvable:$true] %s744_s28 }
  0x17   : > { %s746_s29 = scalar_lea.hbm %s745_s28, 64  ;;  %s751_s7 = scalar_lea.hbm %s1120_s0, 128 }
  0x18   : > { %p747_p2 = scmp.ne.s32.totalorder %s745_s28, %s746_s29  ;;  %p752_p5 = scmp.lt.s32.totalorder %s745_s28, %s1120_s0 }
  0x19   : > { %p753_p8 = scmp.lt.s32.totalorder %s751_s7, %s746_s29 }
  0x1a   : > { %p749_p4 = pnand %p748_p3, %p747_p2 }
  0x1b   : > { %p754_p10 = por %p753_p8, %p752_p5 }
  0x1c   : > { %p750_p7 = pneg %p749_p4 }
  0x1e   : > { %p755_p9 = pnand %p754_p10, %p750_p7 }
  0x20   : > { %758 = shalt.err (!%p755_p9)
}
  0x21   : > { %s874_s11 = smov 256   ;;  %s875_s16 = smov 16  }
  0x22   : > { %688 = dma.hbm_to_vmem [thread:$0]  (!%p979_p13), %s229_s17, 1024, %s231_s19, %s219_s26, %s874_s11, %s874_s11, %s875_s16  }
  0x23   : > { %p239_p2 = pnand %p642_p0, %p238_p1 }
  0x24   : > { %s1000_s18 = sand.u32 (!%p239_p2), 1, %s864_s22  }
  0x25   : > { %242 = sbr.rel (%p239_p2) target bundleno = 578 (0x242), region = 40  ;;  %s643_s28 = sshll.u32 (!%p239_p2), %s1000_s18, 6 }
  0x26   : > { %s245_s29 = scalar_lea.sflag (!%p239_p2), [#allocation3], %s1000_s18  ;;  %s248_s12 = scalar_lea.vmem (!%p239_p2), [#allocation2], %s643_s28 }
  0x2a   : > { %847 = dma.done.wait (%p957_p6), %s245_s29, 1024  }
  0x2b   : > { %849 = vsyncadd (%p957_p6), %s245_s29, 4294966272  ;;  %v876_v0 = vmov 0   ;;  %v289_v1 = vld [vmem:[%s248_s12 + $0x30] sm:$0xff]  ;;  %v290_v2 = vld [vmem:[%s248_s12 + $0x38] sm:$0xff]  ;;  %vm298_vm0 = vcmask 261120   ;;  %s1058_s15 = scalar_lea.vmem [#allocation6], %s643_s28 }
  0x2c   : > { %735 = vset.pattern.permute.xlu0 %v876_v0  ;;  %737 = vset.pattern.permute.xlu2 %v876_v0  ;;  %v287_v3 = vld [vmem:[%s248_s12 + $0x20] sm:$0xff]  ;;  %v288_v4 = vld [vmem:[%s248_s12 + $0x28] sm:$0xff]  ;;  %v285_v5 = vld [vmem:[%s248_s12 + $0x10] sm:$0xff]  ;;  %s666_s28 = sshll.u32 %s935_s25, 6  ;;  %s500_s19 = scalar_lea.sflag [#allocation7], %s1000_s18 }
  0x2d   : > { %736 = vset.pattern.permute.xlu1 %v876_v0  ;;  %314 = vmatpush.msra.mxu0 %v289_v1  ;;  %v286_v6 = vld [vmem:[%s248_s12 + $0x18] sm:$0xff]  ;;  %v292_v7 = vld [vmem:[%s1123_s3] sm:$0xff]  ;;  %v284_v9 = vld [vmem:[%s248_s12 + $0x8] sm:$0xff]  ;;  %s526_s29 = scalar_lea.hbm %s1126_s6, %s666_s28  ;;  %s794_s7 = scalar_lea.hbm %s1126_s6, 128 }
  0x2e   : > { %334 = vmatpush.msra.mxu1 %v290_v2  ;;  %667 = vmatpush.msra.mxu2 %v289_v1  ;;  %v283_v8 = vld [vmem:[%s248_s12] sm:$0xff]  ;;  %v343_v24 = vld [vmem:[%s1122_s2 + $0x8] sm:$0xff]  ;;  %v344_v27 = vld [vmem:[%s1122_s2 + $0x10] sm:$0xff]  ;;  %s527_s12 = sshll.u32 %s1058_s15, 4  ;;  %s529_s17 = sshll.u32 %s526_s29, 4  ;;  %s528_s12 = int_to_ptr.vmem [resolvable:$true] %s527_s12  ;;  %s530_s17 = int_to_ptr.hbm [resolvable:$true] %s529_s17 }
  0x2f   : > { %671 = vmatpush.msra.mxu3 %v290_v2  ;;  %315 = vmatpush.msra.mxu0 %v287_v3  ;;  %v291_v10 = vld [vmem:[%s1121_s1] sm:$0xff]  ;;  %v347_v26 = vld [vmem:[%s1124_s4 + $0x8] sm:$0xff]  ;;  %v348_v28 = vld [vmem:[%s1124_s4 + $0x10] sm:$0xff]  ;;  %s788_s8 = sshra.s32 %s530_s17, 4  ;;  %s789_s8 = int_to_ptr.hbm [resolvable:$true] %s788_s8 }
  0x30   : > { %335 = vmatpush.msra.mxu1 %v288_v4  ;;  %295 = vperm.xlu0 %735, %v292_v7   ;;  %v342_v25 = vld [vmem:[%s1122_s2] sm:$0xff]  ;;  %v345_v29 = vld [vmem:[%s1122_s2 + $0x18] sm:$0xff]  ;;  %p795_p0 = scmp.lt.s32.totalorder %s789_s8, %s1126_s6 }
  0x31   : > { %668 = vmatpush.msra.mxu2 %v287_v3  ;;  %316 = vmatpush.msra.mxu0 %v285_v5  ;;  %v349_v35 = vld [vmem:[%s1124_s4 + $0x18] sm:$0xff]  ;;  %v346_v39 = vld [vmem:[%s1124_s4] sm:$0xff] }
  0x32   : > { %336 = vmatpush.msra.mxu1 %v286_v6  ;;  %672 = vmatpush.msra.mxu3 %v288_v4 }
  0x33   : > { %669 = vmatpush.msra.mxu2 %v285_v5  ;;  %317 = vmatpush.msra.mxu0 %v283_v8 }
  0x34   : > { %337 = vmatpush.msra.mxu1 %v284_v9  ;;  %646 = vmatmul.msk.f32.vlgmr.msra.gmra.mxu0 %vm298_vm0, %v291_v10 }
  0x35   : > { %647 = vmatmul.msk.f32.vlgmr.msra.gmra.mxu1 %vm298_vm0, %v291_v10  ;;  %673 = vmatpush.msra.mxu3 %v286_v6 }
  0x36   : > { %670 = vmatpush.msra.mxu2 %v283_v8  ;;  %394 = vmatpush.msrb.mxu0 %v289_v1 }
  0x37   : > { %423 = vmatpush.msrb.mxu1 %v290_v2  ;;  %674 = vmatpush.msra.mxu3 %v284_v9 }
  0x38   : > { %395 = vmatpush.msrb.mxu0 %v287_v3  ;;  %649 = vmatmul.msk.f32.vlgmr.msra.gmra.mxu2 %vm298_vm0, %v343_v24 }
  0x39   : > { %424 = vmatpush.msrb.mxu1 %v288_v4  ;;  %653 = vmatmul.msk.f32.vlgmr.msra.gmra.mxu3 %vm298_vm0, %v343_v24 }
  0x3a   : > { %396 = vmatpush.msrb.mxu0 %v285_v5  ;;  %357 = vperm.xlu2 %737, %v347_v26  }
  0x3b   : > { %425 = vmatpush.msrb.mxu1 %v286_v6 }
  0x3c   : > { %397 = vmatpush.msrb.mxu0 %v283_v8 }
  0x3d   : > { %426 = vmatpush.msrb.mxu1 %v284_v9  ;;  %648 = vmatmul.msk.f32.vlgmr.msrb.gmra.mxu0 %vm298_vm0, %v342_v25 }
  0x3e   : > { %652 = vmatmul.msk.f32.vlgmr.msrb.gmra.mxu1 %vm298_vm0, %v342_v25 }
  0x40   : > { %650 = vmatmul.msk.f32.gmra.mxu2 %vm298_vm0, %v344_v27 }
  0x41   : > { %654 = vmatmul.msk.f32.gmra.mxu3 %vm298_vm0, %v344_v27 }
  0x42   : > { %362 = vperm.xlu2 %737, %v348_v28  }
  0x48   : > { %651 = vmatmul.msk.f32.gmra.mxu2 %vm298_vm0, %v345_v29 }
  0x49   : > { %655 = vmatmul.msk.f32.gmra.mxu3 %vm298_vm0, %v345_v29 }
  0x4a   : > { %367 = vperm.xlu2 %737, %v349_v35  }
  0x94   : > { %v358_v40 = vpop.permute.xlu2 %357 }
  0x9c   : > { %v363_v45 = vpop.permute.xlu2 %362 }
  0xa2   : > { %v296_v11 = vpop.permute.xlu0 %295 }
  0xa4   : > { %v368_v57 = vpop.permute.xlu2 %367 }
  0xb1   : > { %v319_v12 = vpop.f32.mrf.mxu0 }
  0xb2   : > { %v339_v13 = vpop.f32.mrf.mxu1  ;;  %v320_v14 = vadd.f32 %v319_v12, %v296_v11 }
  0xb3   : > { %v340_v15 = vadd.f32 %v339_v13, %v296_v11 }
  0xb5   : > { %v440_v16 = vmax.f32 %v320_v14, %v340_v15 }
  0xb7   : > { %441 = vmax.xlane.f32.xlu0 %v440_v16 }
  0xba   : > { %v399_v62 = vpop.f32.mrf.mxu0 }
  0xbb   : > { %v402_v41 = vpop.f32.mrf.mxu2  ;;  %v428_v63 = vpop.f32.mrf.mxu1 }
  0xbc   : > { %v431_v42 = vpop.f32.mrf.mxu3  ;;  %v403_v43 = vadd.f32 %v402_v41, %v358_v40 }
  0xbd   : > { %v432_v44 = vadd.f32 %v431_v42, %v358_v40 }
  0xbe   : > { %488 = vst [vmem:[%s1058_s15 + $0x10] sm:$0xff] %v403_v43 }
  0xbf   : > { %489 = vst [vmem:[%s1058_s15 + $0x18] sm:$0xff] %v432_v44 }
  0xc3   : > { %v405_v46 = vpop.f32.mrf.mxu2 }
  0xc4   : > { %v434_v47 = vpop.f32.mrf.mxu3  ;;  %v406_v48 = vadd.f32 %v405_v46, %v363_v45 }
  0xc5   : > { %v435_v49 = vadd.f32 %v434_v47, %v363_v45 }
  0xc6   : > { %490 = vst [vmem:[%s1058_s15 + $0x20] sm:$0xff] %v406_v48 }
  0xc7   : > { %491 = vst [vmem:[%s1058_s15 + $0x28] sm:$0xff] %v435_v49 }
  0xcb   : > { %v408_v58 = vpop.f32.mrf.mxu2 }
  0xcc   : > { %v409_v59 = vadd.f32 %v408_v58, %v368_v57  ;;  %v437_v60 = vpop.f32.mrf.mxu3 }
  0xcd   : > { %v438_v61 = vadd.f32 %v437_v60, %v368_v57 }
  0xce   : > { %492 = vst [vmem:[%s1058_s15 + $0x30] sm:$0xff] %v409_v59 }
  0xcf   : > { %493 = vst [vmem:[%s1058_s15 + $0x38] sm:$0xff] %v438_v61 }
 0x12a   : > { %v442_v17 = vpop.xlane.xlu0 %441 }
 0x12b   : > { %v443_v18 = vrot.slane %v442_v17, 4 }
 0x12d   : > { %v444_v19 = vmax.f32 %v442_v17, %v443_v18 }
 0x12f   : > { %v445_v20 = vrot.slane %v444_v19, 2 }
 0x131   : > { %v446_v21 = vmax.f32 %v444_v19, %v445_v20 }
 0x133   : > { %v447_v22 = vrot.slane %v446_v21, 1 }
 0x135   : > { %v448_v23 = vmax.f32 %v446_v21, %v447_v22 }
 0x137   : > { %675 = vpush %v448_v23 }
 0x168   : > { %s676_s20 = spop %675 }
 0x169   : > { %v450_v30 = vstv %s676_s20  ;;  %s790_s20 = scalar_lea.hbm %s789_s8, 64 }
 0x16a   : > { %v451_v31 = vsub.f32 %v320_v14, %v450_v30  ;;  %v452_v32 = vsub.f32 %v340_v15, %v450_v30  ;;  %p791_p6 = scmp.ne.s32.totalorder %s789_s8, %s790_s20  ;;  %p796_p1 = scmp.lt.s32.totalorder %s794_s7, %s790_s20 }
 0x16c   : > { %v453_v33 = vmul.f32 1.442695, %v451_v31  ;;  %v455_v34 = vmul.f32 1.442695, %v452_v32  ;;  %p792_p9 = pnand %p791_p6, %p964_p11  ;;  %p797_p3 = por %p796_p1, %p795_p0 }
 0x16e   : > { %738 = vpow2.f32 %v453_v33  ;;  %p793_p13 = pneg %p792_p9 }
 0x16f   : > { %740 = vpow2.f32 %v455_v34 }
 0x170   : > { %p798_p4 = pnand %p797_p3, %p793_p13 }
 0x174   : > { %v1047_v36 = vpop.eup %738 }
 0x175   : > { %v1049_v37 = vpop.eup %740 }
 0x176   : > { %v457_v38 = vadd.f32 %v1049_v37, %v1047_v36 }
 0x178   : > { %458 = vadd.xlane.f32.xlu1 %v457_v38 }
 0x191   : > { %352 = vperm.xlu1 %736, %v346_v39  }
 0x1eb   : > { %v459_v50 = vpop.xlane.xlu1 %458 }
 0x1ec   : > { %v460_v51 = vrot.slane %v459_v50, 4 }
 0x1ee   : > { %v461_v52 = vadd.f32 %v460_v51, %v459_v50 }
 0x1f0   : > { %v462_v53 = vrot.slane %v461_v52, 2 }
 0x1f2   : > { %v463_v54 = vadd.f32 %v462_v53, %v461_v52 }
 0x1f4   : > { %v464_v55 = vrot.slane %v463_v54, 1 }
 0x1f6   : > { %v465_v56 = vadd.f32 %v464_v55, %v463_v54 }
 0x1f8   : > { %677 = vpush %v465_v56 }
 0x203   : > { %v353_v0 = vpop.permute.xlu1 %352 }
 0x204   : > { %v400_v1 = vadd.f32 %v399_v62, %v353_v0  ;;  %v429_v2 = vadd.f32 %v428_v63, %v353_v0 }
 0x206   : > { %486 = vst [vmem:[%s1058_s15] sm:$0xff] %v400_v1 }
 0x207   : > { %487 = vst [vmem:[%s1058_s15 + $0x8] sm:$0xff] %v429_v2 }
 0x208   : > { %801 = shalt.err (!%p798_p4)
}
 0x209   : > { %s877_s15 = smov 256   ;;  %s878_s11 = smov 16  }
 0x20a   : > { %682 = dma.vmem_to_hbm [thread:$0]  (%p964_p11), %s528_s12, 1024, %s530_s17, %s500_s19, %s877_s15, %s877_s15, %s878_s11  }
 0x20b   : > { %s644_s29 = sshll.u32 %s1000_s18, 4  ;;  %s665_s26 = sshll.u32 %s935_s25, 4 }
 0x20c   : > { %s511_s13 = scalar_lea.hbm %s1125_s5, %s665_s26  ;;  %s275_s12 = scalar_lea.vmem [#allocation5], %s644_s29 }
 0x20d   : > { %s513_s17 = sshll.u32 %s275_s12, 4  ;;  %s515_s19 = sshll.u32 %s511_s13, 4  ;;  %s514_s17 = int_to_ptr.vmem [resolvable:$true] %s513_s17  ;;  %s516_s19 = int_to_ptr.hbm [resolvable:$true] %s515_s19 }
 0x20e   : > { %s495_s25 = scalar_lea.sflag [#allocation4], %s1000_s18  ;;  %s816_s7 = sshra.s32 %s516_s19, 4  ;;  %s817_s7 = int_to_ptr.hbm [resolvable:$true] %s816_s7 }
 0x20f   : > { %s818_s14 = scalar_lea.hbm %s817_s7, 16  ;;  %s822_s11 = scalar_lea.hbm %s1125_s5, 32 }
 0x210   : > { %p819_p7 = scmp.ne.s32.totalorder %s817_s7, %s818_s14  ;;  %p823_p10 = scmp.lt.s32.totalorder %s817_s7, %s1125_s5 }
 0x211   : > { %p824_p2 = scmp.lt.s32.totalorder %s822_s11, %s818_s14 }
 0x212   : > { %p820_p5 = pnand %p819_p7, %p964_p11 }
 0x213   : > { %p825_p6 = por %p824_p2, %p823_p10 }
 0x214   : > { %p821_p8 = pneg %p820_p5 }
 0x216   : > { %p826_p9 = pnand %p825_p6, %p821_p8 }
 0x229   : > { %s678_s16 = spop %677 }
 0x22a   : > { %v467_v3 = vstv %s678_s16 }
 0x22b   : > { %742 = vrcp.f32 %v467_v3  ;;  %v479_v7 = vand.u32 2147483648, %v467_v3  ;;  %v477_v9 = vand.u32 2147483647, %v467_v3  ;;  %vm473_vm2 = vweird.f32 %v467_v3 }
 0x22d   : > { %v480_v11 = vor.u32 1.1754944e-38, %v479_v7  ;;  %vm478_vm4 = vcmp.eq.f32.partialorder %v477_v9, 8.507059e+37 }
 0x231   : > { %v743_v4 = vpop.eup %742 }
 0x232   : > { %v469_v5 = vmul.f32 %v743_v4, %v467_v3  ;;  %vm474_vm1 = vweird.f32 %v743_v4 }
 0x233   : > { %vm475_vm3 = vmor %vm473_vm2, %vm474_vm1 }
 0x234   : > { %v470_v6 = vsub.f32 1.0, %v469_v5 }
 0x236   : > { %v471_v8 = vmul.f32 %v743_v4, %v470_v6 }
 0x238   : > { %v472_v10 = vadd.f32 %v743_v4, %v471_v8 }
 0x23a   : > { %v476_v12 = vsel %vm475_vm3, %v743_v4, %v472_v10 }
 0x23b   : > { %v481_v13 = vsel %vm478_vm4, %v480_v11, %v476_v12 }
 0x23c   : > { %v482_v14 = vmul.f32 %v1047_v36, %v481_v13  ;;  %v483_v15 = vmul.f32 %v1049_v37, %v481_v13 }
 0x23e   : > { %484 = vst [vmem:[%s275_s12] sm:$0xff] %v482_v14 }
 0x23f   : > { %485 = vst [vmem:[%s275_s12 + $0x8] sm:$0xff] %v483_v15 }
 0x240   : > { %829 = shalt.err (!%p826_p9)
}
 0x241   : > { %681 = dma.vmem_to_hbm [thread:$0]  (%p964_p11), %s514_s17, 256, %s516_s19, %s495_s25  }
 0x242 PF: > { %s544_s18 = sand.u32 1, %s860_s21   ;;  %p1132_p13 = scmp.ge.s32.totalorder %s872_s24, 2 }
 0x243   : > { %s545_s26 = scalar_lea.sflag [#allocation4], %s544_s18 }
 0x244   : > { %p690_p0 = pnand %p1132_p13, %p968_p12 }
 0x246   : > { %p691_p1 = pneg %p690_p0 }
 0x248   : > { %851 = dma.done.wait (%p691_p1), %s545_s26, 256  }
 0x249   : > { %853 = vsyncadd (%p691_p1), %s545_s26, 4294967040  ;;  %s555_s8 = scalar_lea.sflag [#allocation7], %s544_s18 }
 0x24a   : > { %855 = dma.done.wait (%p691_p1), %s555_s8, 1024  }
 0x24b   : > { %857 = vsyncadd (%p691_p1), %s555_s8, 4294966272  ;;  %p23_p11 = scmp.ge.s32.totalorder %s939_s27, 4   ;;  %s1133_s21 = smov %s864_s22 }
 0x24c   : > { %s1134_s22 = smov %s868_s23  ;;  %s1135_s23 = smov %s951_s30 }
 0x24d   : > { %s1136_s24 = smov %s939_s27  ;;  %25 = sbr.rel (!%p23_p11) target bundleno = 7 (0x7), region = 102 }
 0x252   :  { %561 = vsyncpa [#allocation3], 1 }
 0x253   :  { %563 = vsyncpa [#allocation3 + $0x1], 1 }
 0x254   :  { %564 = vsyncpa [#allocation4], 1 }
 0x255   :  { %566 = vsyncpa [#allocation4 + $0x1], 1 }
 0x256   :  { %567 = vsyncpa [#allocation7], 1 }
 0x257   :  { %569 = vsyncpa [#allocation7 + $0x1], 1 }

</bundles_post_ra>
